<compile_context>
chip_gen: v6e
topology: v6e:2x2x1
jax: 0.10.0
libtpu: 0.0.40
codegen_flags: <defaults>
</compile_context>

<pallas_src>
import functools

import jax
import jax.numpy as jnp
from jax import lax
from jax.experimental import pallas as pl
from jax.experimental.pallas import tpu as pltpu

LEAKY_SLOPE = 0.1
ACT_DTYPE = jnp.bfloat16          # activation / matmul-operand dtype (f32 accumulate)


# ---------------------------------------------------------------------------
# Per-generation VMEM sizing (v7x has 64 MiB VMEM vs 128 MiB on v5e/v6e).
# ---------------------------------------------------------------------------
def _tpu_vmem_capacity():
    try:
        return int(pltpu.get_tpu_info().vmem_capacity_bytes)
    except Exception:
        return 128 * 1024 * 1024


_VMEM_CAP = _tpu_vmem_capacity()
_VMEM_BUDGET = max(_VMEM_CAP // 8, 4 * 1024 * 1024)       # budget for pipelined blocks
_VMEM_LIMIT = int(min(_VMEM_CAP // 2, 64 * 1024 * 1024))  # scoped-vmem limit we request


def _pick_u_target(Cin, Cout, S, M, n_extra):
    """Largest time-tile width (multiple of 128) whose buffers fit the VMEM budget."""
    w_bytes = 2 * S * Cout * M * Cin * 2                  # double-buffered bf16 weights
    per_col = (2 * 2 * (Cin + (S + n_extra) * Cout)       # double-buffered bf16 in/out
               + 2 * (M + 1) * Cin                        # im2col + window temporaries
               + 4 * S * Cout)                            # f32 matmul results
    u = (_VMEM_BUDGET - w_bytes) // max(per_col, 1)
    return int(max(128, min(2048, (u // 128) * 128)))


def _choose_tiles(Lp, halo_x, u_target):
    """Pick (U, HB, nT): body width U, halo width HB (both lane-aligned), #time tiles."""
    HB = 128 * max(1, -(-halo_x // 128))
    U = max(128, min(u_target, 128 * (-(-Lp // 128))))
    if U % HB != 0:
        U = HB * (-(-U // HB))
    nT = -(-Lp // U)
    return U, HB, nT


# ---------------------------------------------------------------------------
# The Pallas kernel: S-phase (polyphase) 1-D conv with fused epilogue.
#   refs = body, halo, weights, bias, [res], [addend], out
#   body  : (1, Cin, U)      bf16   columns [t*U, t*U+U) of the padded input
#   halo  : (1, Cin, HB)     bf16   columns [(t+1)*U, (t+1)*U+HB)
#   w     : (S, Cout, M*Cin) bf16   per-phase tap-folded weights
#   bias  : (Cout, 1)        f32
#   out   : (S, 1, Cout, U)         phase-planar output tile
# ---------------------------------------------------------------------------
def _conv_kernel(*refs, S, U, offsets, pre_leaky, post_tanh,
                 has_res, has_add, out_scale):
    body_ref, halo_ref, w_ref, b_ref = refs[0], refs[1], refs[2], refs[3]
    i = 4
    res_ref = add_ref = None
    if has_res:
        res_ref = refs[i]; i += 1
    if has_add:
        add_ref = refs[i]; i += 1
    o_ref = refs[i]

    # (Cin, U + HB) window.  leaky_relu(0) == 0, so applying it to the zero-padded
    # window is identical to applying it before padding (as PyTorch does).
    xw = jnp.concatenate([body_ref[0], halo_ref[0]], axis=-1)
    if pre_leaky:
        xw = jnp.where(xw > 0, xw, LEAKY_SLOPE * xw)

    bias = b_ref[...].astype(jnp.float32)                        # (Cout, 1)
    for ph in range(S):
        # im2col: fold all taps of this phase into one (M*Cin, U) operand so one
        # bf16 MXU matmul does the whole contraction (depth M*Cin instead of Cin).
        xim = jnp.concatenate([xw[:, off:off + U] for off in offsets[ph]], axis=0)
        y = jnp.dot(w_ref[ph], xim, preferred_element_type=jnp.float32) + bias
        if has_res:                         # fused ResBlock residual add
            y = y + res_ref[0].astype(jnp.float32)
        if out_scale != 1.0:                # fused 1/num_resblocks of the MRF mean
            y = y * out_scale
        if has_add:                         # fused MRF running-sum accumulation
            y = y + add_ref[0].astype(jnp.float32)
        if post_tanh:
            y = jnp.tanh(y)
        o_ref[ph, 0] = y.astype(o_ref.dtype)


# ---------------------------------------------------------------------------
# Core wrapper: tiling, BlockSpecs, padding, phase interleave.
# ---------------------------------------------------------------------------
def _conv_core(x, wp, b, *, offsets, left_pad, halo_x, L_out,
               pre_leaky=False, post_tanh=False, res=None, addend=None,
               out_scale=1.0, out_dtype=None):
    B, Cin, L = x.shape
    S, Cout, MC = wp.shape
    M = MC // Cin
    if S > 1:
        assert res is None and addend is None and not post_tanh
    out_dtype = ACT_DTYPE if out_dtype is None else out_dtype
    has_res = res is not None
    has_add = addend is not None

    Lp = -(-L_out // S)                                   # per-phase output length
    u_target = _pick_u_target(Cin, Cout, S, M, int(has_res) + int(has_add))
    U, HB, nT = _choose_tiles(Lp, halo_x, u_target)
    Lpad = nT * U + HB
    hb_per_u = U // HB

    # TODO(synk): the small left/right edge padding is still one jnp.pad HBM pass per
    # conv; fully pad-free halo handling would need element-indexed or manual DMA.
    xp = jnp.pad(x.astype(ACT_DTYPE),
                 ((0, 0), (0, 0), (left_pad, Lpad - left_pad - L)))
    b2 = b.reshape(Cout, 1).astype(jnp.float32)

    in_specs = [
        pl.BlockSpec((1, Cin, U), lambda bi, ti: (bi, 0, ti)),                  # body
        pl.BlockSpec((1, Cin, HB), lambda bi, ti: (bi, 0, (ti + 1) * hb_per_u)),  # halo
        pl.BlockSpec((S, Cout, MC), lambda bi, ti: (0, 0, 0)),                  # weights
        pl.BlockSpec((Cout, 1), lambda bi, ti: (0, 0)),                         # bias
    ]
    inputs = [xp, xp, wp, b2]
    if has_res:
        in_specs.append(pl.BlockSpec((1, Cout, U), lambda bi, ti: (bi, 0, ti)))
        inputs.append(res.astype(ACT_DTYPE))
    if has_add:
        in_specs.append(pl.BlockSpec((1, Cout, U), lambda bi, ti: (bi, 0, ti)))
        inputs.append(addend.astype(ACT_DTYPE))

    kern = functools.partial(
        _conv_kernel, S=S, U=U, offsets=offsets, pre_leaky=pre_leaky,
        post_tanh=post_tanh, has_res=has_res, has_add=has_add,
        out_scale=float(out_scale))

    y = pl.pallas_call(
        kern,
        out_shape=jax.ShapeDtypeStruct((S, B, Cout, Lp), out_dtype),
        grid_spec=pltpu.PrefetchScalarGridSpec(
            num_scalar_prefetch=0,
            grid=(B, nT),
            in_specs=in_specs,
            out_specs=pl.BlockSpec((S, 1, Cout, U), lambda bi, ti: (0, bi, 0, ti)),
        ),
        compiler_params=pltpu.CompilerParams(
            dimension_semantics=("parallel", "parallel"),
            vmem_limit_bytes=_VMEM_LIMIT),
    )(*inputs)

    if S == 1:
        return y[0]                                       # (B, Cout, L_out)
    # Interleave the S polyphase planes back into the time axis (cheap XLA lane
    # interleave: time index = u*S + phase).
    y = jnp.transpose(y, (1, 2, 3, 0)).reshape(B, Cout, S * Lp)
    return y[:, :, :L_out]


# ---------------------------------------------------------------------------
# Weight packing + user-facing conv wrappers.
# ---------------------------------------------------------------------------
def _pack_conv_weights(w):
    """(Cout, Cin, k) -> (1, Cout, k*Cin): column j*Cin + cin = w[:, cin, j]."""
    Cout, Cin, k = w.shape
    return jnp.transpose(w, (0, 2, 1)).reshape(1, Cout, k * Cin).astype(ACT_DTYPE)


def conv1d_same(x, w, b, dilation=1, pre_leaky=False, post_tanh=False,
                res=None, addend=None, out_scale=1.0, out_dtype=None):
    """nn.Conv1d(..., padding='same', dilation=d) with optional fused epilogue."""
    Cout, Cin, k = w.shape
    halo = dilation * (k - 1)
    left = halo // 2                                      # torch 'same' convention
    offsets = (tuple(j * dilation for j in range(k)),)
    return _conv_core(x, _pack_conv_weights(w), b, offsets=offsets,
                      left_pad=left, halo_x=halo, L_out=x.shape[-1],
                      pre_leaky=pre_leaky, post_tanh=post_tanh, res=res,
                      addend=addend, out_scale=out_scale, out_dtype=out_dtype)


def _pack_convT_weights(w, s, p):
    """Polyphase repack of a torch ConvTranspose1d weight (Cin, Cout, k).

    Returns (wp (s, Cout, M*Cin), per-phase tap offsets, left_pad, halo)."""
    Cin, Cout, k = w.shape
    A = k - 1 - p
    j0s = [(A - phi) % s for phi in range(s)]
    dlt = [-((A - phi) // s) for phi in range(s)]
    Ms = [-(-(k - j0) // s) for j0 in j0s]
    M = max(Ms)
    lo = min(dlt)
    halo_x = max(M - 1 + d for d in dlt) - lo
    offsets = tuple(tuple(m + dlt[phi] - lo for m in range(M)) for phi in range(s))
    planes = []
    for phi in range(s):
        taps = []
        for m in range(M):
            j = j0s[phi] + m * s
            if m < Ms[phi] and j < k:
                taps.append(w[:, :, k - 1 - j].T)         # (Cout, Cin)
            else:
                taps.append(jnp.zeros((Cout, Cin), w.dtype))
        planes.append(jnp.concatenate(taps, axis=1))      # (Cout, M*Cin)
    wp = jnp.stack(planes, axis=0).astype(ACT_DTYPE)      # (s, Cout, M*Cin)
    return wp, offsets, -lo, halo_x


def conv_transpose1d(x, w, b, stride, padding, pre_leaky=False, out_dtype=None):
    """nn.ConvTranspose1d (torch weight layout (Cin, Cout, k)) as a polyphase conv."""
    Cin, Cout, k = w.shape
    L = x.shape[-1]
    L_out = (L - 1) * stride - 2 * padding + k
    wp, offsets, left_pad, halo_x = _pack_convT_weights(w, stride, padding)
    return _conv_core(x, wp, b, offsets=offsets, left_pad=left_pad, halo_x=halo_x,
                      L_out=L_out, pre_leaky=pre_leaky, out_dtype=out_dtype)


# ---------------------------------------------------------------------------
# ResBlock / MRF / Generator forward (residual add + MRF mean fused into kernels).
# ---------------------------------------------------------------------------
def resblock_forward(x, ws, bs, d_r, k_r, mrf_scale=None, mrf_acc=None):
    i = 0
    nb = len(d_r)
    for m in range(nb):
        res = x
        nl = len(d_r[m])
        for l in range(nl):
            last_conv = (l == nl - 1)
            fuse_mrf = (mrf_scale is not None) and (m == nb - 1) and last_conv
            if last_conv:
                # residual add (and, for the last branch, 1/N scaling + MRF running
                # sum) fused into this conv's epilogue.
                x = conv1d_same(x, ws[i], bs[i], dilation=d_r[m][l], pre_leaky=True,
                                res=res,
                                out_scale=(mrf_scale if fuse_mrf else 1.0),
                                addend=(mrf_acc if fuse_mrf else None))
            else:
                x = conv1d_same(x, ws[i], bs[i], dilation=d_r[m][l], pre_leaky=True)
            i += 1
    return x


def mrf_forward(x, res_params, D_r, K_r):
    n = len(res_params)
    acc = None
    for p, (d_r, k_r) in zip(res_params, zip(D_r, K_r)):
        acc = resblock_forward(x, p["w"], p["b"], d_r, k_r,
                               mrf_scale=1.0 / n, mrf_acc=acc)
    return acc                                  # == mean over resblock outputs


def generator_forward(params, x, D_r, K_r, k_u):
    x = conv1d_same(x, params["conv_in_w"], params["conv_in_b"])
    for l, ku in enumerate(k_u):
        blk = params["blocks"][l]
        stride = ku // 2
        pad = (ku - stride) // 2
        # nn.LeakyReLU(0.1) is fused into the polyphase transposed-conv kernel.
        x = conv_transpose1d(x, blk["up_w"], blk["up_b"], stride, pad, pre_leaky=True)
        x = mrf_forward(x, blk["res"], D_r, K_r)
    x = conv1d_same(x, params["conv_out_w"], params["conv_out_b"],
                    pre_leaky=True, post_tanh=True, out_dtype=jnp.float32)
    return x


# ---------------------------------------------------------------------------
# Deterministic synthetic parameters (weight_norm folded; normal(0, 0.01)).
# ---------------------------------------------------------------------------
def make_params(key, D_r, K_r, k_u, h_u, in_ch=80):
    def nrm(shape, std=0.01):
        nonlocal key
        key, sub = jax.random.split(key)
        return jax.random.normal(sub, shape, jnp.float32) * std

    params = {
        "conv_in_w": nrm((h_u, in_ch, 7)),
        "conv_in_b": nrm((h_u,)),
    }
    blocks = []
    ch = h_u
    for l, ku in enumerate(k_u):
        out_ch = h_u // 2 ** (l + 1)
        blk = {"up_w": nrm((ch, out_ch, ku)),   # ConvTranspose1d: (Cin, Cout, k)
               "up_b": nrm((out_ch,)),
               "res": []}
        for d_r, k_r in zip(D_r, K_r):
            nconv = sum(len(m) for m in d_r)
            blk["res"].append({
                "w": [nrm((out_ch, out_ch, k_r)) for _ in range(nconv)],
                "b": [nrm((out_ch,)) for _ in range(nconv)],
            })
        blocks.append(blk)
        ch = out_ch
    params["blocks"] = blocks
    params["conv_out_w"] = nrm((1, ch, 7))
    params["conv_out_b"] = nrm((1,))
    return params


if __name__ == "__main__":
    # Small synthetic config consistent with the module's __init__.
    D_r = [[[1, 1], [3, 1]], [[1], [3]]]
    K_r = [3, 5]
    k_u = [4, 4]          # strides 2, 2  -> total upsample x4
    h_u = 32
    B, C_mel, T = 2, 80, 32

    key = jax.random.PRNGKey(0)
    pkey, xkey = jax.random.split(key)
    params = make_params(pkey, D_r, K_r, k_u, h_u, in_ch=C_mel)
    x = jax.random.normal(xkey, (B, C_mel, T), jnp.float32)

    def q(a):  # match the kernel's bf16 operand quantization in the references
        return a.astype(jnp.bfloat16).astype(jnp.float32)

    # --- check 1: Pallas conv vs lax reference (input conv) ------------------
    w_in, b_in = params["conv_in_w"], params["conv_in_b"]
    ref = lax.conv_general_dilated(
        q(x), q(w_in), (1,), [(3, 3)], rhs_dilation=(1,),
        dimension_numbers=("NCH", "OIH", "NCH")) + b_in[None, :, None]
    ref = ref.astype(jnp.bfloat16).astype(jnp.float32)
    got = conv1d_same(x, w_in, b_in).astype(jnp.float32)
    assert got.shape == ref.shape, (got.shape, ref.shape)
    assert jnp.allclose(got, ref, rtol=3e-2, atol=5e-3), \
        float(jnp.max(jnp.abs(got - ref)))

    # --- check 2: polyphase ConvTranspose1d vs lax lhs_dilation reference ----
    blk0 = params["blocks"][0]
    ku0 = k_u[0]; s0 = ku0 // 2; p0 = (ku0 - s0) // 2
    x2 = jax.random.normal(jax.random.PRNGKey(1), (B, h_u, T), jnp.float32)
    w_eq = jnp.transpose(jnp.flip(blk0["up_w"], axis=2), (1, 0, 2))  # (Cout, Cin, k)
    refT = lax.conv_general_dilated(
        q(x2), q(w_eq), (1,), [(ku0 - 1 - p0, ku0 - 1 - p0)], lhs_dilation=(s0,),
        dimension_numbers=("NCH", "OIH", "NCH")) + blk0["up_b"][None, :, None]
    refT = refT.astype(jnp.bfloat16).astype(jnp.float32)
    gotT = conv_transpose1d(x2, blk0["up_w"], blk0["up_b"], s0, p0).astype(jnp.float32)
    assert gotT.shape == refT.shape, (gotT.shape, refT.shape)
    assert jnp.allclose(gotT, refT, rtol=3e-2, atol=5e-3), \
        float(jnp.max(jnp.abs(gotT - refT)))

    # --- full forward ---------------------------------------------------------
    fwd = jax.jit(lambda p, xx: generator_forward(p, xx, D_r, K_r, k_u))
    y = jax.block_until_ready(fwd(params, x))
    assert y.shape == (B, 1, T * 4), y.shape
    assert bool(jnp.all(jnp.isfinite(y)))
    assert bool(jnp.all(jnp.abs(y) <= 1.0))   # tanh output range
    print("KERNEL_OK")
</pallas_src>

<mosaic_0001>
module attributes {stable_mosaic.version = 11 : i64} {
  func.func @_conv_kernel(%arg0: i32, %arg1: i32, %arg2: memref<1x80x128xbf16, #tpu.memory_space<vmem>>, %arg3: memref<1x80x128xbf16, #tpu.memory_space<vmem>>, %arg4: memref<1x32x560xbf16, #tpu.memory_space<vmem>>, %arg5: memref<32x1xf32, #tpu.memory_space<vmem>>, %arg6: memref<1x1x32x128xbf16, #tpu.memory_space<vmem>>) attributes {dimension_semantics = [#tpu.dimension_semantics<parallel>, #tpu.dimension_semantics<parallel>], iteration_bounds = array<i64: 2, 1>, scalar_prefetch = 0 : i64, scratch_operands = 0 : i64, tpu.core_type = #tpu.core_type<tc>, window_params = [{transform_indices = @transform_0, window_bounds = array<i64: 1, 80, 128>}, {transform_indices = @transform_1, window_bounds = array<i64: 1, 80, 128>}, {pipeline_mode = #tpu.pipeline_mode<synchronous>, transform_indices = @transform_2, window_bounds = array<i64: 1, 32, 560>}, {pipeline_mode = #tpu.pipeline_mode<synchronous>, transform_indices = @transform_3, window_bounds = array<i64: 32, 1>}, {transform_indices = @transform_4, window_bounds = array<i64: 1, 1, 32, 128>}]} {
    %c0 = arith.constant 0 : index
    %c0_0 = arith.constant 0 : index
    %c0_1 = arith.constant 0 : index
    %0 = vector.load %arg2[%c0, %c0_0, %c0_1] : memref<1x80x128xbf16, #tpu.memory_space<vmem>>, vector<1x80x128xbf16>
    %1 = vector.shape_cast %0 : vector<1x80x128xbf16> to vector<80x128xbf16>
    %c0_2 = arith.constant 0 : index
    %c0_3 = arith.constant 0 : index
    %c0_4 = arith.constant 0 : index
    %2 = vector.load %arg3[%c0_2, %c0_3, %c0_4] : memref<1x80x128xbf16, #tpu.memory_space<vmem>>, vector<1x80x128xbf16>
    %3 = vector.shape_cast %2 : vector<1x80x128xbf16> to vector<80x128xbf16>
    %4 = tpu.concatenate %1, %3 in 1 : vector<80x128xbf16>, vector<80x128xbf16> -> vector<80x256xbf16>
    %c0_5 = arith.constant 0 : index
    %c0_6 = arith.constant 0 : index
    %5 = vector.load %arg5[%c0_5, %c0_6] : memref<32x1xf32, #tpu.memory_space<vmem>>, vector<32x1xf32>
    %6 = vector.extract_strided_slice %4 {offsets = [0, 0], sizes = [80, 128], strides = [1, 1]} : vector<80x256xbf16> to vector<80x128xbf16>
    %7 = vector.extract_strided_slice %4 {offsets = [0, 1], sizes = [80, 128], strides = [1, 1]} : vector<80x256xbf16> to vector<80x128xbf16>
    %8 = vector.extract_strided_slice %4 {offsets = [0, 2], sizes = [80, 128], strides = [1, 1]} : vector<80x256xbf16> to vector<80x128xbf16>
    %9 = vector.extract_strided_slice %4 {offsets = [0, 3], sizes = [80, 128], strides = [1, 1]} : vector<80x256xbf16> to vector<80x128xbf16>
    %10 = vector.extract_strided_slice %4 {offsets = [0, 4], sizes = [80, 128], strides = [1, 1]} : vector<80x256xbf16> to vector<80x128xbf16>
    %11 = vector.extract_strided_slice %4 {offsets = [0, 5], sizes = [80, 128], strides = [1, 1]} : vector<80x256xbf16> to vector<80x128xbf16>
    %12 = vector.extract_strided_slice %4 {offsets = [0, 6], sizes = [80, 128], strides = [1, 1]} : vector<80x256xbf16> to vector<80x128xbf16>
    %13 = tpu.concatenate %6, %7, %8, %9, %10, %11, %12 in 0 : vector<80x128xbf16>, vector<80x128xbf16>, vector<80x128xbf16>, vector<80x128xbf16>, vector<80x128xbf16>, vector<80x128xbf16>, vector<80x128xbf16> -> vector<560x128xbf16>
    %c0_7 = arith.constant 0 : index
    %c0_8 = arith.constant 0 : index
    %c0_9 = arith.constant 0 : index
    %14 = vector.load %arg4[%c0_7, %c0_8, %c0_9] : memref<1x32x560xbf16, #tpu.memory_space<vmem>>, vector<1x32x560xbf16>
    %15 = vector.shape_cast %14 : vector<1x32x560xbf16> to vector<32x560xbf16>
    %cst = arith.constant dense<0.000000e+00> : vector<32x128xf32>
    %16 = tpu.matmul %15, %13, %cst {dimension_numbers = #tpu.dot_dimension_numbers<[1], [0], [0], [1], [0, 0, 1, 1], [], []>} : vector<32x560xbf16>, vector<560x128xbf16>, vector<32x128xf32> -> vector<32x128xf32>
    %17 = vector.broadcast %5 : vector<32x1xf32> to vector<32x128xf32>
    %18 = arith.addf %16, %17 : vector<32x128xf32>
    %19 = arith.truncf %18 : vector<32x128xf32> to vector<32x128xbf16>
    %c0_10 = arith.constant 0 : index
    %c0_11 = arith.constant 0 : index
    %c0_12 = arith.constant 0 : index
    %c0_13 = arith.constant 0 : index
    %20 = vector.load %arg6[%c0_10, %c0_11, %c0_12, %c0_13] : memref<1x1x32x128xbf16, #tpu.memory_space<vmem>>, vector<1x1x32x128xbf16>
    %21 = vector.shape_cast %20 : vector<1x1x32x128xbf16> to vector<32x128xbf16>
    %22 = vector.shape_cast %19 : vector<32x128xbf16> to vector<1x1x32x128xbf16>
    tpu.vector_store %arg6[%c0_10, %c0_11, %c0_12, %c0_13], %22 {strides = array<i32>} : memref<1x1x32x128xbf16, #tpu.memory_space<vmem>>, vector<1x1x32x128xbf16>,
    return
  }
  func.func @transform_0(%arg0: i32, %arg1: i32) -> (i32, i32, i32) {
    %c0_i32 = arith.constant 0 : i32
    %c0_i32_0 = arith.constant 0 : i32
    return %arg0, %c0_i32, %arg1 : i32, i32, i32
  }
  func.func @transform_1(%arg0: i32, %arg1: i32) -> (i32, i32, i32) {
    %c1_i32 = arith.constant 1 : i32
    %0 = arith.addi %arg1, %c1_i32 : i32
    %c1_i32_0 = arith.constant 1 : i32
    %1 = arith.muli %0, %c1_i32_0 : i32
    %c0_i32 = arith.constant 0 : i32
    %c0_i32_1 = arith.constant 0 : i32
    return %arg0, %c0_i32, %1 : i32, i32, i32
  }
  func.func @transform_2(%arg0: i32, %arg1: i32) -> (i32, i32, i32) {
    %c0_i32 = arith.constant 0 : i32
    %c0_i32_0 = arith.constant 0 : i32
    %c0_i32_1 = arith.constant 0 : i32
    %c0_i32_2 = arith.constant 0 : i32
    return %c0_i32, %c0_i32_0, %c0_i32_1 : i32, i32, i32
  }
  func.func @transform_3(%arg0: i32, %arg1: i32) -> (i32, i32) {
    %c0_i32 = arith.constant 0 : i32
    %c0_i32_0 = arith.constant 0 : i32
    %c0_i32_1 = arith.constant 0 : i32
    return %c0_i32, %c0_i32_0 : i32, i32
  }
  func.func @transform_4(%arg0: i32, %arg1: i32) -> (i32, i32, i32, i32) {
    %c0_i32 = arith.constant 0 : i32
    %c0_i32_0 = arith.constant 0 : i32
    %c0_i32_1 = arith.constant 0 : i32
    return %c0_i32, %arg0, %c0_i32_0, %arg1 : i32, i32, i32, i32
  }
}

</mosaic_0001>

<bundles_post_ra>
// kernel: tpu_custom_call.1
= control target key start
LH: loop header
LB: loop body
LE: loop exit
PB: predicated region body
PF: predicated region fallthrough
CT: control target
= control target key end

     0   :  { %s1788_s0 = inlined_call_operand.hbm [shape: bf16[2,80,256], index: 0, kind: input, shape index: {}]   ;;  %s1789_s1 = inlined_call_operand.hbm [shape: bf16[2,80,256], index: 1, kind: input, shape index: {}]   ;;  %s1790_s2 = inlined_call_operand.hbm [shape: bf16[1,32,560], index: 2, kind: input, shape index: {}]   ;;  %s1791_s3 = inlined_call_operand.vmem [shape: f32[32,1], index: 3, kind: input, shape index: {}]   ;;  %s1792_s4 = inlined_call_operand.hbm [shape: bf16[1,2,32,32], index: 4, kind: output, shape index: {}]  }
   0x1   :  { %1800 = sst [smem:[#allocation18_spill]] %s1788_s0 }
   0x2   :  { %1801 = sst [smem:[#allocation19_spill]] %s1790_s2 }
   0x3   :  { %9 = vsyncpa [#allocation3], 0 }
   0x4   :  { %11 = vsyncpa [#allocation3 + $0x1], 0 }
   0x5   :  { %12 = vsyncpa [#allocation6], 0 }
   0x6   :  { %14 = vsyncpa [#allocation6 + $0x1], 0 }
   0x7   :  { %15 = vsyncpa [#allocation4], 0 }
   0x8   :  { %17 = vsyncpa [#allocation4 + $0x1], 0  ;;  %s1417_s15 = smov 0   ;;  %s1419_s16 = smov 0  }
   0x9   :  { %s1421_s17 = smov 0   ;;  %s1423_s18 = smov 0  }
   0xa   :  { %s1425_s19 = smov 0   ;;  %s1427_s20 = smov 0  }
   0xb LB: > { %1802 = sst [smem:[#allocation13_spill]] %s1352_s15  ;;  %s1448_s21 = sadd.s32 4294967295, %s1372_s20   ;;  %s1372_s20 = sphi %s1427_s20, %s23_s20   ;;  %s1368_s19 = sphi %s1425_s19, %s1832_s19   ;;  %s1364_s18 = sphi %s1423_s18, %s1831_s18   ;;  %s1360_s17 = sphi %s1421_s17, %s1827_s17   ;;  %s1356_s16 = sphi %s1419_s16, %s1830_s16   ;;  %s1352_s15 = sphi %s1417_s15, %s1829_s15  }
   0xc   : > { %1803 = sst [smem:[#allocation14_spill]] %s1360_s17  ;;  %s952_s22 = sadd.s32 4294967294, %s1372_s20  }
   0xd   : > { %p51_p0 = scmp.ne.s32.totalorder %s1360_s17, %s1356_s16  ;;  %p52_p1 = scmp.eq.s32.totalorder %s1372_s20, 0 }
   0xe   : > { %p57_p2 = scmp.ne.s32.totalorder %s1356_s16, %s1352_s15  ;;  %p1793_p3 = scmp.eq.s32.totalorder %s1448_s21, 0 }
   0xf   : > { %p155_p4 = scmp.eq.s32.totalorder %s1448_s21, 1  ;;  %p1459_p5 = por %p52_p1, %p51_p0 }
  0x10   : > { %p161_p6 = scmp.eq.s32.totalorder %s952_s22, 1  ;;  %p1465_p7 = por %p1793_p3, %p57_p2 }
  0x11   : > { %p1469_p8 = por %p155_p4, %p51_p0  ;;  %p953_p10 = scmp.ge.s32.totalorder %s1372_s20, 1 }
  0x12   : > { %s1805_s25 = scalar_select %p1465_p7, 1, 0 }
  0x13   : > { %s1806_s26 = scalar_select %p1469_p8, 1, 0 }
  0x14   : > { %p1473_p9 = por %p161_p6, %p57_p2  ;;  %p168_p11 = scmp.lt.s32.totalorder %s1372_s20, 3 }
  0x15   : > { %s1374_s29 = smov [#allocation7]   ;;  %p1109_p1 = scmp.lt.s32.totalorder %s1372_s20, 2 }
  0x16   : > { %s1807_s27 = scalar_select %p1473_p9, 1, 0 }
  0x17   : > { %p1479_p12 = pnand %p953_p10, %p168_p11  ;;  %s180_s30 = sshll.u32 %s1374_s29, 4  ;;  %s181_s30 = int_to_ptr.vmem [resolvable:$true] %s180_s30 }
  0x18   : > { %1808 = sst [smem:[#allocation15_spill]] %s1807_s27  ;;  %p1495_p2 = pnand %p1109_p1, %p1459_p5 }
  0x19   : > { %p1093_p13 = pneg %p1479_p12  ;;  %s35_s7 = sadd.s32 1, %s1368_s19 }
  0x1a   : > { %p1500_p6 = scmp.ge.s32.totalorder %s35_s7, 2  ;;  %s1212_s9 = scalar_lea.vmem %s181_s30, 1280 }
  0x1b   : > { %p1489_p4 = pnand %p1093_p13, %p1793_p3  ;;  %p1213_p11 = scmp.ne.s32.totalorder %s181_s30, %s1212_s9 }
  0x1c   : > { %p1220_p3 = scmp.lt.s32.totalorder %s181_s30, %s181_s30  ;;  %p1221_p9 = scmp.lt.s32.totalorder %s1212_s9, %s1212_s9 }
  0x1d   : > { %p1203_p10 = pneg %p1489_p4 }
  0x1e   : > { %p1222_p8 = por %p1221_p9, %p1220_p3 }
  0x1f   : > { %p1215_p0 = pnand %p1213_p11, %p1203_p10 }
  0x21   : > { %p1216_p13 = pneg %p1215_p0 }
  0x23   : > { %p1223_p7 = pnand %p1222_p8, %p1216_p13 }
  0x25   : > { %1226 = shalt.err (!%p1223_p7)
}
  0x26   : > { %s1375_s10 = smov 320   ;;  %s1376_s11 = smov 20  }
  0x27   : > { %s1813_s2 = sld [smem:[#allocation19_spill]]  ;;  %s197_s14 = sand.u32 1, %s1360_s17  }
  0x28   : > { %s1834_s7 = smov (%p1500_p6, %s35_s7), 0  ;;  %s1516_s22 = smul.u32 40, %s197_s14 }
  0x29   : > { %1814 = sst [smem:[#allocation16_spill]] %s1834_s7  ;;  %s39_s24 = ssub.s32 %s1368_s19, %s1834_s7 }
  0x2a   : > { %s1080_s29 = smul.u32 1280, %s1368_s19  ;;  %p42_p3 = scmp.eq.s32.totalorder %s39_s24, 0 }
  0x2b   : > { %s1815_s0 = sld [smem:[#allocation18_spill]]  ;;  %s201_s27 = scalar_lea.vmem [#allocation2], %s1516_s22 }
  0x2c   : > { %s209_s12 = sshll.u32 %s201_s27, 4  ;;  %s198_s8 = scalar_lea.sflag [#allocation3], %s197_s14  ;;  %s210_s12 = int_to_ptr.vmem [resolvable:$true] %s209_s12 }
  0x2d   : > { %1096 = dma.hbm_to_vmem [thread:$0]  (!%p1489_p4), %s1813_s2, 1280, %s181_s30, [#allocation6], %s1375_s10, %s1375_s10, %s1376_s11  }
  0x2e   : > { %s1816_s30 = sadd.s32 1, %s1360_s17  ;;  %p1229_p5 = pneg %p1495_p2 }
  0x2f   : > { %s1530_s10 = scalar_select %p42_p3, %s1360_s17, %s1816_s30  }
  0x30   : > { %s1240_s11 = scalar_lea.vmem %s210_s12, 640  ;;  %s1377_s13 = smov [#allocation2]  }
  0x31   : > { %s208_s5 = scalar_lea.hbm %s1815_s0, %s1080_s29  ;;  %1817 = sst [smem:[#allocation17_spill]] %s1530_s10 }
  0x32   : > { %p1241_p7 = scmp.ne.s32.totalorder %s210_s12, %s1240_s11  ;;  %s1245_s24 = sshll.u32 %s1377_s13, 4  ;;  %s1246_s24 = int_to_ptr.vmem [resolvable:$false] %s1245_s24 }
  0x33   : > { %s1247_s23 = scalar_lea.vmem %s1246_s24, 1280  ;;  %p1248_p0 = scmp.lt.s32.totalorder %s210_s12, %s1246_s24 }
  0x34   : > { %p1243_p8 = pnand %p1241_p7, %p1229_p5  ;;  %p1249_p1 = scmp.lt.s32.totalorder %s1247_s23, %s1240_s11 }
  0x36   : > { %p1244_p9 = pneg %p1243_p8  ;;  %p1250_p4 = por %p1249_p1, %p1248_p0 }
  0x38   : > { %p1251_p6 = pnand %p1250_p4, %p1244_p9 }
  0x3a   : > { %1254 = shalt.err (!%p1251_p6)
}
  0x3b   : > { %s1378_s27 = smov 128   ;;  %s1379_s14 = smov 64  }
  0x3c   : > { %s1380_s9 = smov 4   ;;  %s219_s30 = sand.u32 1, %s1372_s20  }
  0x3d   : > { %1100 = dma.hbm_to_vmem [thread:$0]  (!%p1495_p2), %s208_s5, 640, %s210_s12, %s198_s8, %s1378_s27, %s1379_s14, %s1380_s9  }
  0x3e   : > { %s874_s24 = scalar_lea.hbm %s1789_s1, %s1080_s29  ;;  %s223_s23 = scalar_lea.vmem [#allocation5], %s1516_s22 }
  0x3f   : > { %s875_s11 = scalar_lea.hbm %s874_s24, 64  ;;  %s232_s2 = sshll.u32 %s223_s23, 4  ;;  %s233_s2 = int_to_ptr.vmem [resolvable:$true] %s232_s2 }
  0x40   : > { %s220_s7 = scalar_lea.sflag [#allocation6], %s219_s30  ;;  %s1268_s10 = scalar_lea.vmem %s233_s2, 640 }
  0x41   : > { %p1269_p10 = scmp.ne.s32.totalorder %s233_s2, %s1268_s10  ;;  %s1381_s17 = smov [#allocation5]  }
  0x42   : > { %s1273_s15 = sshll.u32 %s1381_s17, 4  ;;  %s1274_s15 = int_to_ptr.vmem [resolvable:$false] %s1273_s15 }
  0x43   : > { %p1271_p11 = pnand %p1269_p10, %p1229_p5  ;;  %s1275_s5 = scalar_lea.vmem %s1274_s15, 1280 }
  0x44   : > { %p1276_p3 = scmp.lt.s32.totalorder %s233_s2, %s1274_s15  ;;  %p1277_p7 = scmp.lt.s32.totalorder %s1275_s5, %s1268_s10 }
  0x45   : > { %p1272_p13 = pneg %p1271_p11 }
  0x46   : > { %p1278_p8 = por %p1277_p7, %p1276_p3 }
  0x48   : > { %p1279_p9 = pnand %p1278_p8, %p1272_p13 }
  0x4a   : > { %1282 = shalt.err (!%p1279_p9)
}
  0x4b   : > { %1103 = dma.hbm_to_vmem [thread:$0]  (!%p1495_p2), %s875_s11, 640, %s233_s2, %s220_s7, %s1378_s27, %s1379_s14, %s1380_s9  }
  0x4c   : > { %244 = sbr.rel (%p1479_p12) target bundleno = 542 (0x21e), region = 36  ;;  %s1554_s0 = sand.u32 (!%p1479_p12), 1, %s1356_s16  }
  0x4d   : > { %s1082_s17 = smul.u32 (!%p1479_p12), 40, %s1554_s0  ;;  %s247_s22 = scalar_lea.sflag (!%p1479_p12), [#allocation3], %s1554_s0 }
  0x4e   : > { %p1818_p5 = scmp.ne.s32.totalorder (!%p1479_p12), %s1805_s25, 0 }
  0x4f   : > { %s1558_s29 = scalar_lea.vmem (!%p1479_p12), [#allocation2], %s1082_s17 }
  0x51   : > { %1335 = dma.done.wait (%p1818_p5), %s247_s22, 640  }
  0x52   : > { %1337 = vsyncadd (%p1818_p5), %s247_s22, 4294966656  ;;  %s255_s2 = sand.u32 1, %s1448_s21   ;;  %s259_s28 = scalar_lea.vmem [#allocation5], %s1082_s17 }
  0x53   : > { %s256_s15 = scalar_lea.sflag [#allocation6], %s255_s2 }
  0x54   : > { %1339 = dma.done.wait (%p1818_p5), %s256_s15, 640  }
  0x55   : > { %1341 = vsyncadd (%p1818_p5), %s256_s15, 4294966656  ;;  %p1819_p12 = scmp.eq.s32.totalorder %s1448_s21, 0 }
  0x57   : > { %1343 = dma.done.wait (%p1819_p12), [#allocation6], 1280   ;;  %p1820_p2 = pmov %p1819_p12 }
  0x58   : > { %v1574_v0 = vld [vmem:[%s1558_s29 + $0x10] sm:$0xff]   ;;  %v1577_v1 = vld [vmem:[%s1558_s29] sm:$0xff]   ;;  %s1382_s6 = smov 127   ;;  %s1383_s25 = smov 125   ;;  %v1183_v6 = vld [vmem:[%s259_s28 + $0x8] sm:$0xff]   ;;  %v1388_v12 = vmov 0  }
  0x59   : > { %1345 = vsyncadd (%p1820_p2), [#allocation6], 4294966016  ;;  %382 = vrot.lane.b32.xlu1 %v1574_v0, %s1382_s6  ;;  %v1581_v2 = vld [vmem:[%s259_s28 + $0x10] sm:$0xff]   ;;  %436 = vrot.lane.b32.xlu0 %v1577_v1, %s1383_s25  ;;  %v1180_v3 = vld [vmem:[%s259_s28] sm:$0xff]   ;;  %s1384_s21 = smov 126   ;;  %s1385_s7 = smov 122  }
  0x5a   : > { %v1587_v4 = vld [vmem:[%s259_s28 + $0x20] sm:$0xff]   ;;  %v1591_v5 = vld [vmem:[%s1558_s29 + $0x20] sm:$0xff]   ;;  %v1594_v7 = vld [vmem:[%s1558_s29 + $0x8] sm:$0xff]   ;;  %s1386_s12 = smov 124   ;;  %s1387_s10 = smov 123   ;;  %1176 = vset.pattern.permute.xlu1 %v1388_v12  ;;  %1175 = vset.pattern.permute.xlu0 %v1388_v12  ;;  %vm394_vm0 = vcmask 1039360  }
  0x5b   : > { %v1185_v8 = vld [vmem:[%s259_s28 + $0x18] sm:$0xff]   ;;  %v1607_v9 = vld [vmem:[%s1558_s29 + $0x18] sm:$0xff]   ;;  %vm456_vm1 = vcmask 1022976   ;;  %vm425_vm2 = vcmask 1031168   ;;  %vm549_vm3 = vcmask 998400   ;;  %vm487_vm4 = vcmask 1014784  }
  0x5c   : > { %v1189_v10 = vld [vmem:[#allocation7 + $0x4] ss:$20 sps:$4 sm:$0xff]   ;;  %v1192_v11 = vld [vmem:[#allocation7 + $0xc] ss:$20 sps:$4 sm:$0xff]   ;;  %v372_v21 = vld [vmem:[%s1791_s3 + $0x10] sm:$0xff]  ;;  %vm518_vm5 = vcmask 1006592  }
  0x5d   : > { %384 = vrot.lane.b32.xlu1 %v1581_v2, %s1382_s6  ;;  %438 = vrot.lane.b32.xlu0 %v1180_v3, %s1383_s25  ;;  %v371_v15 = vld [vmem:[%s1791_s3 + $0x8] sm:$0xff]  ;;  %v370_v17 = vld [vmem:[%s1791_s3] sm:$0xff]  ;;  %vm642_vm6 = vcmask 392192   ;;  %s960_s23 = sshll.u32 %s1554_s0, 4  ;;  %s996_s22 = sshll.u32 %s1364_s18, 8 }
  0x5e   : > { %681 = vmatprep.mubr.bf16.mxu0 %v1189_v10  ;;  %730 = vmatprep.mubr.bf16.mxu1 %v1192_v11  ;;  %v373_v23 = vld [vmem:[%s1791_s3 + $0x18] sm:$0xff]  ;;  %s292_s5 = scalar_lea.vmem [#allocation8], %s960_s23  ;;  %s1740_s15 = scalar_lea.hbm %s1792_s4, %s996_s22 }
  0x5f   : > { %s831_s17 = sshll.u32 %s292_s5, 4  ;;  %s817_s18 = scalar_lea.sflag [#allocation4], %s1554_s0  ;;  %s1735_s17 = int_to_ptr.vmem [resolvable:$true] %s831_s17 }
  0x60   : > { %s1284_s28 = scalar_lea.vmem %s1735_s17, 256  ;;  %p1821_p1 = scmp.ne.s32.totalorder %s1806_s26, 0 }
  0x61   : > { %423 = vrot.lane.b32.xlu1 %v1587_v4, %s1384_s21  ;;  %421 = vrot.lane.b32.xlu0 %v1591_v5, %s1384_s21  ;;  %p1285_p0 = scmp.ne.s32.totalorder %s1735_s17, %s1284_s28 }
  0x63   : > { %p1286_p4 = pnand %p1285_p0, %p1821_p1 }
  0x65   : > { %535 = vrot.lane.b32.xlu1 %v1183_v6, %s1385_s7  ;;  %533 = vrot.lane.b32.xlu0 %v1594_v7, %s1385_s7  ;;  %p1287_p6 = pneg %p1286_p4 }
  0x69   : > { %380 = vrot.lane.b32.xlu1 %v1183_v6, %s1382_s6  ;;  %378 = vrot.lane.b32.xlu0 %v1594_v7, %s1382_s6 }
  0x6d   : > { %481 = vrot.lane.b32.xlu1 %v1185_v8, %s1386_s12  ;;  %479 = vrot.lane.b32.xlu0 %v1607_v9, %s1386_s12 }
  0x71   : > { %419 = vrot.lane.b32.xlu1 %v1185_v8, %s1384_s21  ;;  %417 = vrot.lane.b32.xlu0 %v1607_v9, %s1384_s21 }
  0x75   : > { %531 = vrot.lane.b32.xlu1 %v1180_v3, %s1385_s7  ;;  %529 = vrot.lane.b32.xlu0 %v1577_v1, %s1385_s7 }
  0x79   : > { %376 = vrot.lane.b32.xlu1 %v1180_v3, %s1382_s6  ;;  %374 = vrot.lane.b32.xlu0 %v1577_v1, %s1382_s6 }
  0x7d   : > { %477 = vrot.lane.b32.xlu1 %v1581_v2, %s1386_s12  ;;  %475 = vrot.lane.b32.xlu0 %v1574_v0, %s1386_s12 }
  0x81   : > { %415 = vrot.lane.b32.xlu1 %v1581_v2, %s1384_s21  ;;  %413 = vrot.lane.b32.xlu0 %v1574_v0, %s1384_s21 }
  0x85   : > { %516 = vrot.lane.b32.xlu1 %v1587_v4, %s1387_s10  ;;  %514 = vrot.lane.b32.xlu0 %v1591_v5, %s1387_s10 }
  0x89   : > { %473 = vrot.lane.b32.xlu1 %v1183_v6, %s1386_s12  ;;  %471 = vrot.lane.b32.xlu0 %v1594_v7, %s1386_s12 }
  0x8d   : > { %411 = vrot.lane.b32.xlu1 %v1183_v6, %s1384_s21  ;;  %409 = vrot.lane.b32.xlu0 %v1594_v7, %s1384_s21 }
  0x91   : > { %512 = vrot.lane.b32.xlu1 %v1185_v8, %s1387_s10  ;;  %510 = vrot.lane.b32.xlu0 %v1607_v9, %s1387_s10 }
  0x95   : > { %469 = vrot.lane.b32.xlu1 %v1180_v3, %s1386_s12  ;;  %467 = vrot.lane.b32.xlu0 %v1577_v1, %s1386_s12 }
  0x99   : > { %407 = vrot.lane.b32.xlu1 %v1180_v3, %s1384_s21  ;;  %405 = vrot.lane.b32.xlu0 %v1577_v1, %s1384_s21 }
  0x9d   : > { %508 = vrot.lane.b32.xlu1 %v1581_v2, %s1387_s10  ;;  %506 = vrot.lane.b32.xlu0 %v1574_v0, %s1387_s10 }
  0xa1   : > { %454 = vrot.lane.b32.xlu1 %v1587_v4, %s1383_s25  ;;  %452 = vrot.lane.b32.xlu0 %v1591_v5, %s1383_s25 }
  0xa5   : > { %392 = vrot.lane.b32.xlu1 %v1587_v4, %s1382_s6  ;;  %390 = vrot.lane.b32.xlu0 %v1591_v5, %s1382_s6 }
  0xa9   : > { %504 = vrot.lane.b32.xlu1 %v1183_v6, %s1387_s10  ;;  %502 = vrot.lane.b32.xlu0 %v1594_v7, %s1387_s10 }
  0xad   : > { %450 = vrot.lane.b32.xlu1 %v1185_v8, %s1383_s25  ;;  %448 = vrot.lane.b32.xlu0 %v1607_v9, %s1383_s25 }
  0xb1   : > { %388 = vrot.lane.b32.xlu1 %v1185_v8, %s1382_s6  ;;  %386 = vrot.lane.b32.xlu0 %v1607_v9, %s1382_s6  ;;  %s1389_s6 = smov [#allocation8]  }
  0xb5   : > { %500 = vrot.lane.b32.xlu1 %v1180_v3, %s1387_s10  ;;  %498 = vrot.lane.b32.xlu0 %v1577_v1, %s1387_s10 }
  0xb9   : > { %446 = vrot.lane.b32.xlu1 %v1581_v2, %s1383_s25  ;;  %444 = vrot.lane.b32.xlu0 %v1574_v0, %s1383_s25 }
  0xbd   : > { %485 = vrot.lane.b32.xlu1 %v1587_v4, %s1386_s12  ;;  %483 = vrot.lane.b32.xlu0 %v1591_v5, %s1386_s12 }
  0xc1   : > { %442 = vrot.lane.b32.xlu1 %v1183_v6, %s1383_s25  ;;  %440 = vrot.lane.b32.xlu0 %v1594_v7, %s1383_s25  ;;  %s1288_s25 = sshll.u32 %s1389_s6, 4  ;;  %s1289_s25 = int_to_ptr.vmem [resolvable:$false] %s1288_s25 }
  0xc2   : > { %s1290_s21 = scalar_lea.vmem %s1289_s25, 512  ;;  %p1291_p10 = scmp.lt.s32.totalorder %s1735_s17, %s1289_s25 }
  0xc3   : > { %p1292_p11 = scmp.lt.s32.totalorder %s1290_s21, %s1284_s28 }
  0xc5   : > { %547 = vrot.lane.b32.xlu1 %v1587_v4, %s1385_s7  ;;  %545 = vrot.lane.b32.xlu0 %v1591_v5, %s1385_s7  ;;  %p1293_p13 = por %p1292_p11, %p1291_p10 }
  0xc7   : > { %p1294_p3 = pnand %p1293_p13, %p1287_p6 }
  0xc9   : > { %543 = vrot.lane.b32.xlu1 %v1185_v8, %s1385_s7  ;;  %541 = vrot.lane.b32.xlu0 %v1607_v9, %s1385_s7 }
  0xcb   : > { %v383_v13 = vpop.permute.xlu1 %382  ;;  %v437_v14 = vpop.permute.xlu0 %436 }
  0xcd   : > { %539 = vrot.lane.b32.xlu1 %v1581_v2, %s1385_s7  ;;  %537 = vrot.lane.b32.xlu0 %v1574_v0, %s1385_s7 }
  0xcf   : > { %v385_v16 = vpop.permute.xlu1 %384  ;;  %v439_v18 = vpop.permute.xlu0 %438 }
  0xd0   : > { %v397_v19 = vsel %vm394_vm0, %v383_v13, %v385_v16  ;;  %v457_v20 = vsel %vm456_vm1, %v437_v14, %v439_v18 }
  0xd1   : > { %579 = vperm.xlu1 %1176, %v371_v15   ;;  %1008 = vmatprep.subr.bf16.mxu0 %v457_v20 }
  0xd2   : > { %574 = vperm.xlu0 %1175, %v370_v17   ;;  %1009 = vmatpush3.bf16.msra.mxu0 %v397_v19 }
  0xd3   : > { %v424_v22 = vpop.permute.xlu1 %423  ;;  %v422_v24 = vpop.permute.xlu0 %421 }
  0xd4   : > { %v430_v25 = vsel %vm425_vm2, %v422_v24, %v424_v22  ;;  %v1187_v24 = vld [vmem:[#allocation7] ss:$20 sps:$4 sm:$0xff]  }
  0xd5   : > { %584 = vperm.xlu1 %1176, %v372_v21   ;;  %1010 = vmatprep.subr.bf16.mxu0 %v430_v25 }
  0xd6   : > { %589 = vperm.xlu0 %1175, %v373_v23  }
  0xd7   : > { %v536_v26 = vpop.permute.xlu1 %535  ;;  %v534_v27 = vpop.permute.xlu0 %533 }
  0xd8   : > { %v551_v28 = vsel %vm549_vm3, %v534_v27, %v536_v26  ;;  %v1193_v26 = vld [vmem:[#allocation7 + $0x2c] ss:$20 sps:$4 sm:$0xff]  }
  0xd9   : > { %1036 = vmatprep.subr.bf16.mxu1 %v551_v28 }
  0xdb   : > { %v381_v29 = vpop.permute.xlu1 %380  ;;  %v379_v30 = vpop.permute.xlu0 %378 }
  0xdc   : > { %v396_v31 = vsel %vm394_vm0, %v379_v30, %v381_v29 }
  0xdd   : > { %1011 = vmatpush3.bf16.msra.mxu0 %v396_v31  ;;  %v1195_v31 = vld [vmem:[#allocation7 + $0x28] ss:$20 sps:$4 sm:$0xff]  }
  0xdf   : > { %v482_v32 = vpop.permute.xlu1 %481  ;;  %v480_v33 = vpop.permute.xlu0 %479 }
  0xe0   : > { %v491_v34 = vsel %vm487_vm4, %v480_v33, %v482_v32  ;;  %v1199_v33 = vld [vmem:[#allocation7 + $0x10] ss:$20 sps:$4 sm:$0xff]  }
  0xe1   : > { %1037 = vmatpush3.bf16.msra.mxu1 %v491_v34 }
  0xe3   : > { %v420_v35 = vpop.permute.xlu1 %419  ;;  %v418_v36 = vpop.permute.xlu0 %417 }
  0xe4   : > { %v429_v37 = vsel %vm425_vm2, %v418_v36, %v420_v35 }
  0xe5   : > { %1012 = vmatprep.subr.bf16.mxu0 %v429_v37 }
  0xe7   : > { %v532_v38 = vpop.permute.xlu1 %531  ;;  %v530_v39 = vpop.permute.xlu0 %529 }
  0xe8   : > { %v550_v40 = vsel %vm549_vm3, %v530_v39, %v532_v38  ;;  %v1190_v38 = vld [vmem:[#allocation7 + $0x8] ss:$20 sps:$4 sm:$0xff]  }
  0xe9   : > { %1038 = vmatprep.subr.bf16.mxu1 %v550_v40  ;;  %v1196_v39 = vld [vmem:[#allocation7 + $0x34] ss:$20 sps:$4 sm:$0xff]  }
  0xeb   : > { %v377_v41 = vpop.permute.xlu1 %376  ;;  %v375_v42 = vpop.permute.xlu0 %374 }
  0xec   : > { %v395_v43 = vsel %vm394_vm0, %v375_v42, %v377_v41 }
  0xed   : > { %1013 = vmatpush3.bf16.msra.mxu0 %v395_v43 }
  0xef   : > { %v478_v44 = vpop.permute.xlu1 %477  ;;  %v476_v45 = vpop.permute.xlu0 %475 }
  0xf0   : > { %v490_v46 = vsel %vm487_vm4, %v476_v45, %v478_v44 }
  0xf1   : > { %1039 = vmatpush3.bf16.msra.mxu1 %v490_v46  ;;  %v1198_v46 = vld [vmem:[#allocation7 + $0x30] ss:$20 sps:$4 sm:$0xff]  }
  0xf3   : > { %v416_v47 = vpop.permute.xlu1 %415  ;;  %v414_v48 = vpop.permute.xlu0 %413 }
  0xf4   : > { %v428_v49 = vsel %vm425_vm2, %v414_v48, %v416_v47 }
  0xf5   : > { %1014 = vmatprep.subr.bf16.mxu0 %v428_v49 }
  0xf6   : > { %1015 = vmatpush3.bf16.msra.mxu0 %v1591_v5 }
  0xf7   : > { %v517_v50 = vpop.permute.xlu1 %516  ;;  %v515_v51 = vpop.permute.xlu0 %514 }
  0xf8   : > { %v523_v52 = vsel %vm518_vm5, %v515_v51, %v517_v50  ;;  %v1200_v50 = vld [vmem:[#allocation7 + $0x38] ss:$20 sps:$4 sm:$0xff]  }
  0xf9   : > { %1040 = vmatprep.subr.bf16.mxu1 %v523_v52 }
  0xfb   : > { %v474_v53 = vpop.permute.xlu1 %473  ;;  %v472_v54 = vpop.permute.xlu0 %471 }
  0xfc   : > { %v489_v55 = vsel %vm487_vm4, %v472_v54, %v474_v53 }
  0xfd   : > { %1041 = vmatpush3.bf16.msra.mxu1 %v489_v55 }
  0xff   : > { %v412_v56 = vpop.permute.xlu1 %411  ;;  %v410_v57 = vpop.permute.xlu0 %409 }
 0x100   : > { %v427_v58 = vsel %vm425_vm2, %v410_v57, %v412_v56 }
 0x101   : > { %1016 = vmatprep.subr.bf16.mxu0 %v427_v58 }
 0x102   : > { %1017 = vmatpush3.bf16.msra.mxu0 %v1607_v9 }
 0x103   : > { %v513_v59 = vpop.permute.xlu1 %512  ;;  %v511_v60 = vpop.permute.xlu0 %510 }
 0x104   : > { %v522_v61 = vsel %vm518_vm5, %v511_v60, %v513_v59 }
 0x105   : > { %1042 = vmatprep.subr.bf16.mxu1 %v522_v61 }
 0x107   : > { %v470_v62 = vpop.permute.xlu1 %469  ;;  %v468_v63 = vpop.permute.xlu0 %467 }
 0x108   : > { %v488_v2 = vsel %vm487_vm4, %v468_v63, %v470_v62 }
 0x109   : > { %1043 = vmatpush3.bf16.msra.mxu1 %v488_v2 }
 0x10b   : > { %v408_v3 = vpop.permute.xlu1 %407  ;;  %v406_v4 = vpop.permute.xlu0 %405 }
 0x10c   : > { %v426_v5 = vsel %vm425_vm2, %v406_v4, %v408_v3 }
 0x10d   : > { %1018 = vmatprep.subr.bf16.mxu0 %v426_v5 }
 0x10e   : > { %1019 = vmatpush3.bf16.msra.mxu0 %v1574_v0 }
 0x10f   : > { %v509_v6 = vpop.permute.xlu1 %508  ;;  %v507_v8 = vpop.permute.xlu0 %506 }
 0x110   : > { %v521_v9 = vsel %vm518_vm5, %v507_v8, %v509_v6 }
 0x111   : > { %1044 = vmatprep.subr.bf16.mxu1 %v521_v9 }
 0x113   : > { %v455_v10 = vpop.permute.xlu1 %454  ;;  %v453_v11 = vpop.permute.xlu0 %452 }
 0x114   : > { %v461_v12 = vsel %vm456_vm1, %v453_v11, %v455_v10 }
 0x115   : > { %1045 = vmatpush3.bf16.msra.mxu1 %v461_v12 }
 0x117   : > { %v393_v13 = vpop.permute.xlu1 %392  ;;  %v391_v14 = vpop.permute.xlu0 %390 }
 0x118   : > { %v399_v15 = vsel %vm394_vm0, %v391_v14, %v393_v13 }
 0x119   : > { %1020 = vmatprep.subr.bf16.mxu0 %v399_v15 }
 0x11a   : > { %1021 = vmatpush3.bf16.msra.mxu0 %v1594_v7 }
 0x11b   : > { %v505_v16 = vpop.permute.xlu1 %504  ;;  %v503_v17 = vpop.permute.xlu0 %502 }
 0x11c   : > { %v520_v0 = vsel %vm518_vm5, %v503_v17, %v505_v16 }
 0x11d   : > { %1046 = vmatprep.subr.bf16.mxu1 %v520_v0 }
 0x11f   : > { %v451_v18 = vpop.permute.xlu1 %450  ;;  %v449_v19 = vpop.permute.xlu0 %448 }
 0x120   : > { %v460_v20 = vsel %vm456_vm1, %v449_v19, %v451_v18 }
 0x121   : > { %1047 = vmatpush3.bf16.msra.mxu1 %v460_v20 }
 0x123   : > { %v389_v21 = vpop.permute.xlu1 %388  ;;  %v387_v22 = vpop.permute.xlu0 %386 }
 0x124   : > { %v398_v23 = vsel %vm394_vm0, %v387_v22, %v389_v21 }
 0x125   : > { %1022 = vmatprep.subr.bf16.mxu0 %v398_v23 }
 0x126   : > { %1023 = vmatpush3.bf16.msra.mxu0 %v1577_v1 }
 0x127   : > { %v501_v25 = vpop.permute.xlu1 %500  ;;  %v499_v7 = vpop.permute.xlu0 %498 }
 0x128   : > { %v519_v27 = vsel %vm518_vm5, %v499_v7, %v501_v25 }
 0x129   : > { %1048 = vmatprep.subr.bf16.mxu1 %v519_v27  ;;  %682 = vmatmul.mubr.bf16.vlgmr.msra.gmra.mxu0 %v1187_v24 }
 0x12a   : > { %689 = vmatprep.mubr.bf16.mxu0 %v1193_v26 }
 0x12b   : > { %v447_v28 = vpop.permute.xlu1 %446  ;;  %v445_v29 = vpop.permute.xlu0 %444 }
 0x12c   : > { %v459_v30 = vsel %vm456_vm1, %v445_v29, %v447_v28 }
 0x12d   : > { %1049 = vmatpush3.bf16.msra.mxu1 %v459_v30 }
 0x12f   : > { %v486_v32 = vpop.permute.xlu1 %485  ;;  %v484_v34 = vpop.permute.xlu0 %483 }
 0x130   : > { %v492_v35 = vsel %vm487_vm4, %v484_v34, %v486_v32 }
 0x131   : > { %1050 = vmatprep.subr.bf16.mxu1 %v492_v35  ;;  %690 = vmatmul.mubr.bf16.gmra.mxu0 %v1195_v31 }
 0x132   : > { %1075 = vmatprep.mubr.msk.bf16.mxu0 %vm642_vm6, %v1199_v33 }
 0x133   : > { %v443_v1 = vpop.permute.xlu1 %442  ;;  %v441_v36 = vpop.permute.xlu0 %440 }
 0x134   : > { %v458_v37 = vsel %vm456_vm1, %v441_v36, %v443_v1 }
 0x135   : > { %1051 = vmatpush3.bf16.msra.mxu1 %v458_v37 }
 0x137   : > { %v548_v40 = vpop.permute.xlu1 %547  ;;  %v546_v41 = vpop.permute.xlu0 %545 }
 0x138   : > { %731 = vmatmul.mubr.bf16.vlgmr.msra.gmra.mxu1 %v1190_v38  ;;  %v554_v42 = vsel %vm549_vm3, %v546_v41, %v548_v40 }
 0x139   : > { %1069 = vmatprep.subr.bf16.mxu0 %v554_v42  ;;  %738 = vmatprep.mubr.bf16.mxu1 %v1196_v39 }
 0x13a   : > { %1070 = vmatpush3.bf16.msra.mxu0 %v554_v42 }
 0x13b   : > { %v544_v43 = vpop.permute.xlu1 %543  ;;  %v542_v44 = vpop.permute.xlu0 %541 }
 0x13c   : > { %v553_v45 = vsel %vm549_vm3, %v542_v44, %v544_v43 }
 0x13d   : > { %1071 = vmatprep.subr.bf16.mxu0 %v553_v45 }
 0x13e   : > { %1072 = vmatpush3.bf16.msra.mxu0 %v553_v45 }
 0x13f   : > { %v540_v47 = vpop.permute.xlu1 %539  ;;  %v538_v48 = vpop.permute.xlu0 %537 }
 0x140   : > { %739 = vmatmul.mubr.bf16.gmra.mxu1 %v1198_v46  ;;  %v552_v49 = vsel %vm549_vm3, %v538_v48, %v540_v47 }
 0x141   : > { %1073 = vmatprep.subr.bf16.mxu0 %v552_v49 }
 0x142   : > { %1074 = vmatpush3.bf16.msra.mxu0 %v552_v49 }
 0x145   : > { %1076 = vmatmul.mubr.msk.bf16.vlgmr.msra.gmra.mxu0 %vm642_vm6, %v1200_v50 }
 0x14c   : > { %v580_v61 = vpop.permute.xlu1 %579 }
 0x14d   : > { %v575_v63 = vpop.permute.xlu0 %574 }
 0x150   : > { %v585_v6 = vpop.permute.xlu1 %584 }
 0x151   : > { %v590_v13 = vpop.permute.xlu0 %589 }
 0x1e9   : > { %v1024_v51 = vpop.f32.mrf.mxu0 }
 0x1eb   : > { %v1025_v52 = vpop.f32.mrf.mxu0 }
 0x1ec   : > { %v1026_v10 = vadd.f32 %v1025_v52, %v1024_v51 }
 0x1ed   : > { %v1027_v53 = vpop.f32.mrf.mxu0 }
 0x1ee   : > { %v684_v23 = vadd.f32 %v1026_v10, %v575_v63 }
 0x1ef   : > { %v1028_v54 = vpop.f32.mrf.mxu0 }
 0x1f0   : > { %v1029_v11 = vadd.f32 %v1028_v54, %v1027_v53 }
 0x1f1   : > { %v1030_v55 = vpop.f32.mrf.mxu0 }
 0x1f2   : > { %v687_v22 = vadd.f32 %v1029_v11, %v580_v61 }
 0x1f3   : > { %v1031_v57 = vpop.f32.mrf.mxu0 }
 0x1f4   : > { %v1032_v4 = vadd.f32 %v1031_v57, %v1030_v55 }
 0x1f5   : > { %v1033_v60 = vpop.f32.mrf.mxu0 }
 0x1f6   : > { %v692_v14 = vadd.f32 %v1032_v4, %v585_v6 }
 0x1f7   : > { %v1034_v3 = vpop.f32.mrf.mxu0 }
 0x1f8   : > { %v1052_v56 = vpop.f32.mrf.mxu1  ;;  %v1035_v8 = vadd.f32 %v1034_v3, %v1033_v60 }
 0x1fa   : > { %v1053_v58 = vpop.f32.mrf.mxu1  ;;  %v695_v18 = vadd.f32 %v1035_v8, %v590_v13 }
 0x1fb   : > { %v1054_v16 = vadd.f32 %v1053_v58, %v1052_v56 }
 0x1fc   : > { %v1055_v59 = vpop.f32.mrf.mxu1 }
 0x1fd   : > { %v733_v26 = vadd.f32 %v1054_v16, %v684_v23 }
 0x1fe   : > { %v1056_v62 = vpop.f32.mrf.mxu1 }
 0x1ff   : > { %v1057_v17 = vadd.f32 %v1056_v62, %v1055_v59 }
 0x200   : > { %v1058_v2 = vpop.f32.mrf.mxu1 }
 0x201   : > { %v736_v7 = vadd.f32 %v1057_v17, %v687_v22 }
 0x202   : > { %v1059_v5 = vpop.f32.mrf.mxu1 }
 0x203   : > { %v1060_v9 = vadd.f32 %v1059_v5, %v1058_v2 }
 0x204   : > { %v1061_v12 = vpop.f32.mrf.mxu1 }
 0x205   : > { %v1077_v15 = vpop.f32.mrf.mxu0  ;;  %v741_v19 = vadd.f32 %v1060_v9, %v692_v14 }
 0x206   : > { %v1062_v0 = vpop.f32.mrf.mxu1 }
 0x207   : > { %v1063_v20 = vadd.f32 %v1062_v0, %v1061_v12  ;;  %v781_v21 = vpop.f32.mrf.mxu0  ;;  %v790_v27 = vadd.f32 %v1077_v15, %v741_v19 }
 0x208   : > { %v782_v30 = vadd.f32 %v781_v21, %v733_v26 }
 0x209   : > { %v744_v24 = vadd.f32 %v1063_v20, %v695_v18  ;;  %v1078_v25 = vpop.f32.mrf.mxu0 }
 0x20b   : > { %v793_v28 = vadd.f32 %v1078_v25, %v744_v24  ;;  %v784_v29 = vpop.f32.mrf.mxu0 }
 0x20c   : > { %v785_v31 = vadd.f32 %v784_v29, %v736_v7 }
 0x20d   : > { %v1005_v32 = vpack.c.bf16 %v793_v28, %v790_v27 }
 0x20e   : > { %v1000_v33 = vpack.c.bf16 %v785_v31, %v782_v30 }
 0x20f   : > { %1007 = vst [vmem:[%s292_s5 + $0x8] sm:$0xff] %v1005_v32  }
 0x210   : > { %1001 = vst [vmem:[%s292_s5] sm:$0xff] %v1000_v33  }
 0x211   : > { %1297 = shalt.err (!%p1294_p3)
}
 0x212   : > { %s1298_s7 = scalar_lea.hbm %s1740_s15, 256  ;;  %s1302_s8 = scalar_lea.hbm %s1792_s4, 512 }
 0x213   : > { %p1299_p7 = scmp.ne.s32.totalorder %s1740_s15, %s1298_s7  ;;  %p1303_p5 = scmp.lt.s32.totalorder %s1740_s15, %s1792_s4 }
 0x214   : > { %p1304_p12 = scmp.lt.s32.totalorder %s1302_s8, %s1298_s7 }
 0x215   : > { %p1300_p8 = pnand %p1299_p7, %p1821_p1 }
 0x216   : > { %p1305_p2 = por %p1304_p12, %p1303_p5 }
 0x217   : > { %p1301_p9 = pneg %p1300_p8 }
 0x219   : > { %p1306_p0 = pnand %p1305_p2, %p1301_p9 }
 0x21b   : > { %1309 = shalt.err (!%p1306_p0)
}
 0x21c   : > { %s1390_s9 = smov 64   ;;  %s1391_s30 = smov 4  }
 0x21d   : > { %1091 = dma.vmem_to_hbm [thread:$0]  (%p1821_p1), %s1735_s17, 256, %s1740_s15, %s817_s18, %s1390_s9, %s1390_s9, %s1391_s30  }
 0x21e PF: > { %s1822_s13 = sld [smem:[#allocation13_spill]]  ;;  %p1825_p6 = scmp.ge.s32.totalorder %s1372_s20, 2 }
 0x21f   : > { %s1823_s24 = sld [smem:[#allocation15_spill]] }
 0x224   : > { %s846_s11 = sand.u32 1, %s1822_s13  }
 0x225   : > { %p1824_p4 = scmp.ne.s32.totalorder %s1823_s24, 0  ;;  %s847_s23 = scalar_lea.sflag [#allocation4], %s846_s11 }
 0x227   : > { %p1105_p10 = pnand %p1825_p6, %p1824_p4 }
 0x229   : > { %p1106_p11 = pneg %p1105_p10 }
 0x22b   : > { %1347 = dma.done.wait (%p1106_p11), %s847_s23, 256  }
 0x22c   : > { %1349 = vsyncadd (%p1106_p11), %s847_s23, 4294967040  ;;  %s23_s20 = sadd.s32 1, %s1372_s20   ;;  %s1826_s5 = sld [smem:[#allocation14_spill]] }
 0x22d   : > { %p20_p13 = scmp.ge.s32.totalorder %s23_s20, 4   ;;  %s1827_s17 = sld [smem:[#allocation17_spill]] }
 0x22e   : > { %s1828_s26 = sld [smem:[#allocation16_spill]]  ;;  %s1829_s15 = smov %s1356_s16 }
 0x22f   : > { %s1831_s18 = smov %s1368_s19 }
 0x230   :  { %22 = sbr.rel (!%p20_p13) target bundleno = 11 (0xb), region = 98 }
 0x232   : > { %s1830_s16 = smov %s1826_s5 }
 0x234   : > { %s1832_s19 = smov %s1828_s26 }
 0x235   :  { %852 = vsyncpa [#allocation3], 1 }
 0x236   :  { %854 = vsyncpa [#allocation3 + $0x1], 1 }
 0x237   :  { %855 = vsyncpa [#allocation6], 1 }
 0x238   :  { %857 = vsyncpa [#allocation6 + $0x1], 1 }
 0x239   :  { %858 = vsyncpa [#allocation4], 1 }
 0x23a   :  { %860 = vsyncpa [#allocation4 + $0x1], 1 }

</bundles_post_ra>
